<compile_context>
chip_gen: v5e
topology: v5e:2x2
jax: 0.10.0
libtpu: 0.0.40
codegen_flags: <defaults>
</compile_context>

<pallas_src>
import jax
import jax.numpy as jnp
import numpy as np
from jax import lax
from jax.experimental import pallas as pl
from jax.experimental.pallas import tpu as pltpu

EPS = 1e-5
MXU_DTYPE = jnp.bfloat16            # MXU operand dtype (f32 accumulation)
CONV1_STORE_DTYPE = jnp.bfloat16    # conv1 intermediate HBM dtype (consumer is bf16 MXU)


# ---------------------------------------------------------------------------
# Weight repacking (host side, done once).
#   band[(kh*W + w_in)*Cin + ci, w_out*Cout + co] = W[co, ci, kh, kw]
#     with w_in = w_out + kw - 1 (out-of-range kw taps absent -> W-padding folded in).
# The kh taps are stacked along the K axis so the conv is ONE matmul per tile.
# TODO(synk): for large W*Cin the banded weight grows O(W^2*Cin*Cout); switch to a
#             per-tap (Cin, Cout) matmul tiling for big-channel ResNet stages (v5e
#             especially, where the ~W/3 redundant FLOPs bind sooner).
# ---------------------------------------------------------------------------
def _pack_conv3x3_band(w_oihw, width, dtype):
    cout, cin = int(w_oihw.shape[0]), int(w_oihw.shape[1])
    w = jnp.transpose(w_oihw, (2, 3, 1, 0)).astype(jnp.float32)   # (kh, kw, cin, cout)
    taps = []
    for kh in range(3):
        b = jnp.zeros((width * cin, width * cout), jnp.float32)
        for kw in range(3):
            eye = jnp.eye(width, width, k=1 - kw, dtype=jnp.float32)
            b = b + jnp.kron(eye, w[kh, kw])
        taps.append(b)
    return jnp.concatenate(taps, axis=0).astype(dtype)            # (3*W*Cin, W*Cout)


def _pack_conv1x1_center_band(w_oihw, width, cin, dtype):
    """1x1 shortcut as (3*W*Cin, W*Cout), nonzero only in the center-kh row block."""
    cout = int(w_oihw.shape[0])
    w = w_oihw.reshape(cout, cin).T.astype(jnp.float32)           # (cin, cout)
    center = jnp.kron(jnp.eye(width, dtype=jnp.float32), w)       # (W*Cin, W*Cout)
    zeros = jnp.zeros_like(center)
    return jnp.concatenate([zeros, center, zeros], axis=0).astype(dtype)


# ---------------------------------------------------------------------------
# Tiling helpers.
# ---------------------------------------------------------------------------
def _nbytes(shape, dtype):
    return int(np.prod(shape)) * jnp.dtype(dtype).itemsize


def _vmem_limit(tile_bytes):
    # double-buffered tiles + headroom; capped below v7x's 64 MiB physical VMEM.
    return int(min(56 << 20, max(16 << 20, 2 * tile_bytes + (4 << 20))))


def _imgs_per_step(n, h, target_rows=512, min_split_rows=256):
    """Images per grid step: big row tiles (~512 rows) for MXU M / HBM roofline,
    but keep >=2 grid steps for the v7x 2-TC split when each step stays >=256 rows.
    Tiles always hold an integral number of images (needed for the halo masks)."""
    per = max(1, min(n, max(1, target_rows // h)))
    while n % per:                      # TODO(synk): masked last block for ragged n
        per -= 1
    if per == n and n > 1 and (n // 2) * h >= min_split_rows:
        per = n // 2
        while n % per:
            per -= 1
    return per


# ---------------------------------------------------------------------------
# Kernel A: per-lane sum / sum-of-squares for BN1 (the one unavoidable extra pass
# over x). Per-step partial outputs keep the grid axis "parallel"-safe.
# ---------------------------------------------------------------------------
def _stats_kernel(x_ref, sum_ref, sq_ref):
    x = x_ref[...].astype(jnp.float32)
    wc = x.shape[1]
    sum_ref[...] = jnp.sum(x, axis=0, keepdims=True).reshape(1, 1, wc)
    sq_ref[...] = jnp.sum(x * x, axis=0, keepdims=True).reshape(1, 1, wc)


def batch_stats(x_rows, bm):
    rows, wc = x_rows.shape
    assert rows % bm == 0
    steps = rows // bm
    tile_bytes = _nbytes((bm, wc), x_rows.dtype) + 2 * _nbytes((1, 1, wc), jnp.float32)
    s, q = pl.pallas_call(
        _stats_kernel,
        grid=(steps,),
        in_specs=[pl.BlockSpec((bm, wc), lambda i: (i, 0))],
        out_specs=(pl.BlockSpec((1, 1, wc), lambda i: (i, 0, 0)),
                   pl.BlockSpec((1, 1, wc), lambda i: (i, 0, 0))),
        out_shape=(jax.ShapeDtypeStruct((steps, 1, wc), jnp.float32),
                   jax.ShapeDtypeStruct((steps, 1, wc), jnp.float32)),
        compiler_params=pltpu.CompilerParams(
            dimension_semantics=("parallel",),
            vmem_limit_bytes=_vmem_limit(tile_bytes)),
    )(x_rows)
    return s.sum(axis=0), q.sum(axis=0)        # each (1, wc)


def _bn_affine(sum_wc, sq_wc, gamma, beta, width, chans, count):
    """Fold per-lane sums to per-channel, return (1, W*C) scale/shift tiles."""
    s = sum_wc.reshape(width, chans).sum(axis=0)
    q = sq_wc.reshape(width, chans).sum(axis=0)
    mean = s / count
    var = q / count - mean * mean               # biased batch variance (torch BN fwd)
    scale = gamma * lax.rsqrt(var + EPS)
    shift = beta - mean * scale
    scale_wc = jnp.tile(scale, width).reshape(1, width * chans)
    shift_wc = jnp.tile(shift, width).reshape(1, width * chans)
    return scale_wc, shift_wc


# ---------------------------------------------------------------------------
# Fused kernel: BN-apply + ReLU + 3x3 conv in ONE matmul per tile
#               (+ optional fused 1x1 shortcut columns, residual add, BN stats).
# ---------------------------------------------------------------------------
def _make_fused_kernel(bm, h, wc_in, wc_out, *, with_shortcut, with_residual,
                       emit_stats, mxu_dtype):
    def kernel(*refs):
        it = iter(refs)
        x_ref = next(it); scale_ref = next(it); shift_ref = next(it); band_ref = next(it)
        res_ref = next(it) if with_residual else None
        relu_ref = next(it); conv_ref = next(it)
        sc_ref = next(it) if with_shortcut else None
        sum_ref = next(it) if emit_stats else None
        sq_ref = next(it) if emit_stats else None

        # Pre-activation BN (batch affine precomputed) + ReLU in f32 on the VPU.
        a = jnp.maximum(x_ref[...].astype(jnp.float32) * scale_ref[...]
                        + shift_ref[...], 0.0)                        # (bm, wc_in)
        relu_ref[...] = a.astype(relu_ref.dtype)
        # TODO(synk): relu1's lane width is W*Cin (<128 at this test shape) -> masked
        #             stores; pack two images per lane row for lane-dense stores at
        #             small-channel stages.

        # kh halo: roll rows by +/-1 and zero rows that crossed an image boundary
        # (each tile holds an integral number of images, so row % h is row-in-image).
        row = lax.broadcasted_iota(jnp.int32, (bm, wc_in), 0) % h
        t_prev = jnp.where(row == 0, 0.0, jnp.roll(a, 1, axis=0))      # input row r-1 (kh=0)
        t_next = jnp.where(row == h - 1, 0.0, jnp.roll(a, -1, axis=0))  # input row r+1 (kh=2)

        # Single MXU matmul: K = 3*W*Cin, N = W*Cout (+ W*Cout shortcut columns).
        lhs = jnp.concatenate([t_prev, a, t_next], axis=1).astype(mxu_dtype)
        mm = jnp.dot(lhs, band_ref[...], preferred_element_type=jnp.float32)

        conv = mm[:, :wc_out]
        if with_residual:
            conv = conv + res_ref[...].astype(jnp.float32)
        conv_q = conv.astype(conv_ref.dtype)
        conv_ref[...] = conv_q
        if with_shortcut:
            sc_ref[...] = mm[:, wc_out:].astype(sc_ref.dtype)

        if emit_stats:
            # BN2 partial stats on the values as stored (bf16-rounded) so the
            # downstream BN-apply is self-consistent; accumulation stays f32.
            cf = conv_q.astype(jnp.float32)
            sum_ref[...] = jnp.sum(cf, axis=0, keepdims=True).reshape(1, 1, wc_out)
            sq_ref[...] = jnp.sum(cf * cf, axis=0, keepdims=True).reshape(1, 1, wc_out)
    return kernel


def fused_bn_relu_conv3x3(x_rows, scale, shift, band, *, h, imgs_per_step, wc_out,
                          with_shortcut=False, residual=None, emit_stats=False,
                          conv_dtype=jnp.float32, mxu_dtype=MXU_DTYPE):
    rows, wc_in = x_rows.shape
    bm = imgs_per_step * h
    assert rows % bm == 0
    steps = rows // bm
    with_residual = residual is not None
    assert band.shape[0] == 3 * wc_in
    assert band.shape[1] == (2 * wc_out if with_shortcut else wc_out)

    in_specs = [
        pl.BlockSpec((bm, wc_in), lambda i: (i, 0)),
        pl.BlockSpec((1, wc_in), lambda i: (0, 0)),
        pl.BlockSpec((1, wc_in), lambda i: (0, 0)),
        pl.BlockSpec(band.shape, lambda i: (0, 0)),
    ]
    args = [x_rows, scale, shift, band]
    if with_residual:
        in_specs.append(pl.BlockSpec((bm, wc_out), lambda i: (i, 0)))
        args.append(residual)

    out_shape = [jax.ShapeDtypeStruct((rows, wc_in), jnp.float32),     # relu (module output)
                 jax.ShapeDtypeStruct((rows, wc_out), conv_dtype)]     # conv (+ residual)
    out_specs = [pl.BlockSpec((bm, wc_in), lambda i: (i, 0)),
                 pl.BlockSpec((bm, wc_out), lambda i: (i, 0))]
    if with_shortcut:
        out_shape.append(jax.ShapeDtypeStruct((rows, wc_out), jnp.float32))
        out_specs.append(pl.BlockSpec((bm, wc_out), lambda i: (i, 0)))
    if emit_stats:
        out_shape += [jax.ShapeDtypeStruct((steps, 1, wc_out), jnp.float32)] * 2
        out_specs += [pl.BlockSpec((1, 1, wc_out), lambda i: (i, 0, 0))] * 2

    tile_bytes = (
        _nbytes((bm, wc_in), x_rows.dtype) + 2 * _nbytes((1, wc_in), jnp.float32)
        + _nbytes(band.shape, band.dtype)
        + (_nbytes((bm, wc_out), residual.dtype) if with_residual else 0)
        + _nbytes((bm, wc_in), jnp.float32) + _nbytes((bm, wc_out), conv_dtype)
        + (_nbytes((bm, wc_out), jnp.float32) if with_shortcut else 0)
        + (2 * _nbytes((1, 1, wc_out), jnp.float32) if emit_stats else 0))

    kernel = _make_fused_kernel(bm, h, wc_in, wc_out,
                                with_shortcut=with_shortcut,
                                with_residual=with_residual,
                                emit_stats=emit_stats, mxu_dtype=mxu_dtype)
    return pl.pallas_call(
        kernel,
        grid=(steps,),
        in_specs=in_specs,
        out_specs=tuple(out_specs),
        out_shape=tuple(out_shape),
        compiler_params=pltpu.CompilerParams(
            dimension_semantics=("parallel",),     # image blocks independent -> 2-TC split
            vmem_limit_bytes=_vmem_limit(tile_bytes)),
    )(*args)


# ---------------------------------------------------------------------------
# PreActBlock
# ---------------------------------------------------------------------------
class PreActBlockPallas:
    expansion = 1

    def __init__(self, in_planes, planes, stride=1, *, key, mxu_dtype=MXU_DTYPE):
        assert stride == 1, "TODO(synk): strided conv path not implemented in the Pallas kernels"
        self.in_planes, self.planes, self.stride = in_planes, planes, stride
        self.mxu_dtype = mxu_dtype
        ks = jax.random.split(key, 7)
        s1 = 1.0 / np.sqrt(in_planes * 9)
        s2 = 1.0 / np.sqrt(planes * 9)
        self.conv1_w = jax.random.normal(ks[0], (planes, in_planes, 3, 3), jnp.float32) * s1
        self.conv2_w = jax.random.normal(ks[1], (planes, planes, 3, 3), jnp.float32) * s2
        self.bn1_g = 1.0 + 0.1 * jax.random.normal(ks[2], (in_planes,), jnp.float32)
        self.bn1_b = 0.1 * jax.random.normal(ks[3], (in_planes,), jnp.float32)
        self.bn2_g = 1.0 + 0.1 * jax.random.normal(ks[4], (planes,), jnp.float32)
        self.bn2_b = 0.1 * jax.random.normal(ks[5], (planes,), jnp.float32)
        self.has_shortcut = (stride != 1) or (in_planes != self.expansion * planes)
        if self.has_shortcut:
            self.sc_w = jax.random.normal(
                ks[6], (self.expansion * planes, in_planes, 1, 1), jnp.float32) / np.sqrt(in_planes)
        self._band_cache = {}

    def _bands(self, width):
        if width not in self._band_cache:
            b1 = _pack_conv3x3_band(self.conv1_w, width, self.mxu_dtype)
            if self.has_shortcut:
                bsc = _pack_conv1x1_center_band(self.sc_w, width, self.in_planes, self.mxu_dtype)
                b1 = jnp.concatenate([b1, bsc], axis=1)   # one matmul emits [conv1 | shortcut]
            b2 = _pack_conv3x3_band(self.conv2_w, width, self.mxu_dtype)
            self._band_cache[width] = (b1, b2)
        return self._band_cache[width]

    def __call__(self, x_nchw):
        n, c, h, w = x_nchw.shape
        assert c == self.in_planes
        assert h % 8 == 0, "row-tiled kernels assume H is a multiple of 8"
        p = self.planes
        wc_in, wc_out = w * c, w * p

        # Layout plumbing at the module boundary only (a full ResNet would keep the
        # row-packed (N*H, W*C) layout between blocks).
        x_rows = jnp.transpose(x_nchw, (0, 2, 3, 1)).reshape(n * h, wc_in)

        per = _imgs_per_step(n, h)
        bm = per * h
        band1, band2 = self._bands(w)

        # --- BN1 batch stats (Pallas reduction) + tiny per-channel affine glue.
        s1, q1 = batch_stats(x_rows, bm)
        scale1, shift1 = _bn_affine(s1, q1, self.bn1_g, self.bn1_b, w, c, n * h * w)

        # --- kernel 1: BN1-apply + ReLU + conv1 (+ fused 1x1 shortcut) + BN2 partial stats.
        if self.has_shortcut:
            relu1_rows, conv1_rows, sc_rows, s2p, q2p = fused_bn_relu_conv3x3(
                x_rows, scale1, shift1, band1, h=h, imgs_per_step=per, wc_out=wc_out,
                with_shortcut=True, emit_stats=True, conv_dtype=CONV1_STORE_DTYPE,
                mxu_dtype=self.mxu_dtype)
        else:
            relu1_rows, conv1_rows, s2p, q2p = fused_bn_relu_conv3x3(
                x_rows, scale1, shift1, band1, h=h, imgs_per_step=per, wc_out=wc_out,
                with_shortcut=False, emit_stats=True, conv_dtype=CONV1_STORE_DTYPE,
                mxu_dtype=self.mxu_dtype)
            sc_rows = x_rows                          # identity shortcut (Cin == Cout)

        # --- BN2 affine from the fused partial stats (no second pass over conv1).
        scale2, shift2 = _bn_affine(s2p.sum(axis=0), q2p.sum(axis=0),
                                    self.bn2_g, self.bn2_b, w, p, n * h * w)

        # --- kernel 2: BN2-apply + ReLU + conv2 + residual add.
        relu2_rows, out_rows = fused_bn_relu_conv3x3(
            conv1_rows, scale2, shift2, band2, h=h, imgs_per_step=per, wc_out=wc_out,
            residual=sc_rows, emit_stats=False, conv_dtype=jnp.float32,
            mxu_dtype=self.mxu_dtype)

        def to_nchw(rows, ch):
            return jnp.transpose(rows.reshape(n, h, w, ch), (0, 3, 1, 2))

        return to_nchw(relu1_rows, c), to_nchw(relu2_rows, p), to_nchw(out_rows, p)


# ---------------------------------------------------------------------------
# Pure-JAX f32 reference (mirrors the torch forward) for the correctness check.
# ---------------------------------------------------------------------------
def reference(block, x):
    def bn(t, g, b):
        mean = t.mean(axis=(0, 2, 3), keepdims=True)
        var = ((t - mean) ** 2).mean(axis=(0, 2, 3), keepdims=True)
        return (t - mean) / jnp.sqrt(var + EPS) * g.reshape(1, -1, 1, 1) + b.reshape(1, -1, 1, 1)

    def conv(t, w, pad):
        return lax.conv_general_dilated(
            t, w, (1, 1), [(pad, pad), (pad, pad)],
            dimension_numbers=("NCHW", "OIHW", "NCHW"))

    relu1 = jnp.maximum(bn(x, block.bn1_g, block.bn1_b), 0.0)
    shortcut = conv(relu1, block.sc_w, 0) if block.has_shortcut else x
    out = conv(relu1, block.conv1_w, 1)
    relu2 = jnp.maximum(bn(out, block.bn2_g, block.bn2_b), 0.0)
    out = conv(relu2, block.conv2_w, 1) + shortcut
    return relu1, relu2, out


if __name__ == "__main__":
    key = jax.random.PRNGKey(0)
    k_x, k_p = jax.random.split(key)

    in_planes, planes = 4, 8                     # in_planes != planes -> shortcut conv exists
    x = jax.random.normal(k_x, (2, in_planes, 16, 16), jnp.float32)

    block = PreActBlockPallas(in_planes, planes, stride=1, key=k_p)

    relu1, relu2, out = block(x)
    jax.block_until_ready((relu1, relu2, out))

    r1, r2, ro = reference(block, x)
    # relu1 is pure f32 (BN+ReLU); relu2/out go through bf16 MXU operands and a bf16
    # conv1 intermediate -> looser tolerance.
    np.testing.assert_allclose(np.asarray(relu1), np.asarray(r1), atol=1e-3, rtol=1e-3)
    np.testing.assert_allclose(np.asarray(relu2), np.asarray(r2), atol=5e-2, rtol=5e-2)
    np.testing.assert_allclose(np.asarray(out), np.asarray(ro), atol=5e-2, rtol=5e-2)

    assert relu1.shape == (2, in_planes, 16, 16)
    assert relu2.shape == (2, planes, 16, 16)
    assert out.shape == (2, planes, 16, 16)

    print("KERNEL_OK")
</pallas_src>

<mosaic_0001>
module attributes {stable_mosaic.version = 11 : i64} {
  func.func @_stats_kernel(%arg0: i32, %arg1: memref<32x64xf32, #tpu.memory_space<vmem>>, %arg2: memref<1x1x64xf32, #tpu.memory_space<vmem>>, %arg3: memref<1x1x64xf32, #tpu.memory_space<vmem>>) attributes {dimension_semantics = [#tpu.dimension_semantics<parallel>], iteration_bounds = array<i64: 1>, scalar_prefetch = 0 : i64, scratch_operands = 0 : i64, tpu.core_type = #tpu.core_type<tc>, window_params = [{transform_indices = @transform_0, window_bounds = array<i64: 32, 64>}, {transform_indices = @transform_1, window_bounds = array<i64: 1, 1, 64>}, {transform_indices = @transform_2, window_bounds = array<i64: 1, 1, 64>}]} {
    %c0 = arith.constant 0 : index
    %c0_0 = arith.constant 0 : index
    %0 = vector.load %arg1[%c0, %c0_0] : memref<32x64xf32, #tpu.memory_space<vmem>>, vector<32x64xf32>
    %cst = arith.constant dense<0.000000e+00> : vector<64xf32>
    %1 = vector.multi_reduction <add>, %0, %cst [0] : vector<32x64xf32> to vector<64xf32>
    %2 = vector.shape_cast %1 : vector<64xf32> to vector<1x64xf32>
    %3 = vector.shape_cast %2 : vector<1x64xf32> to vector<1x1x64xf32>
    %c0_1 = arith.constant 0 : index
    %c0_2 = arith.constant 0 : index
    %c0_3 = arith.constant 0 : index
    %4 = vector.load %arg2[%c0_1, %c0_2, %c0_3] : memref<1x1x64xf32, #tpu.memory_space<vmem>>, vector<1x1x64xf32>
    tpu.vector_store %arg2[%c0_1, %c0_2, %c0_3], %3 {strides = array<i32>} : memref<1x1x64xf32, #tpu.memory_space<vmem>>, vector<1x1x64xf32>,
    %5 = arith.mulf %0, %0 : vector<32x64xf32>
    %cst_4 = arith.constant dense<0.000000e+00> : vector<64xf32>
    %6 = vector.multi_reduction <add>, %5, %cst_4 [0] : vector<32x64xf32> to vector<64xf32>
    %7 = vector.shape_cast %6 : vector<64xf32> to vector<1x64xf32>
    %8 = vector.shape_cast %7 : vector<1x64xf32> to vector<1x1x64xf32>
    %c0_5 = arith.constant 0 : index
    %c0_6 = arith.constant 0 : index
    %c0_7 = arith.constant 0 : index
    %9 = vector.load %arg3[%c0_5, %c0_6, %c0_7] : memref<1x1x64xf32, #tpu.memory_space<vmem>>, vector<1x1x64xf32>
    tpu.vector_store %arg3[%c0_5, %c0_6, %c0_7], %8 {strides = array<i32>} : memref<1x1x64xf32, #tpu.memory_space<vmem>>, vector<1x1x64xf32>,
    return
  }
  func.func @transform_0(%arg0: i32) -> (i32, i32) {
    %c0_i32 = arith.constant 0 : i32
    %c0_i32_0 = arith.constant 0 : i32
    return %arg0, %c0_i32 : i32, i32
  }
  func.func @transform_1(%arg0: i32) -> (i32, i32, i32) {
    %c0_i32 = arith.constant 0 : i32
    %c0_i32_0 = arith.constant 0 : i32
    %c0_i32_1 = arith.constant 0 : i32
    return %arg0, %c0_i32, %c0_i32_0 : i32, i32, i32
  }
  func.func @transform_2(%arg0: i32) -> (i32, i32, i32) {
    %c0_i32 = arith.constant 0 : i32
    %c0_i32_0 = arith.constant 0 : i32
    %c0_i32_1 = arith.constant 0 : i32
    return %arg0, %c0_i32, %c0_i32_0 : i32, i32, i32
  }
}

</mosaic_0001>

<bundles_post_ra>
// kernel: tpu_custom_call.1
= control target key start
LH: loop header
LB: loop body
LE: loop exit
PB: predicated region body
PF: predicated region fallthrough
CT: control target
= control target key end

     0   :  { %8 = vsyncpa [#allocation3], 0  ;;  %s219_s0 = inlined_call_operand.hbm [shape: f32[32,64], index: 0, kind: input, shape index: {}]   ;;  %s220_s1 = inlined_call_operand.hbm [shape: f32[1,1,64], index: 1, kind: output, shape index: {0}]   ;;  %s221_s2 = inlined_call_operand.hbm [shape: f32[1,1,64], index: 2, kind: output, shape index: {1}]  }
   0x1   :  { %9 = vsyncpa [#allocation4], 0 }
   0x2   :  { %10 = vsyncpa [#allocation7], 0  ;;  %s15_s11 = sshll.u32 %s219_s0, 4  ;;  %s182_s12 = smov [#allocation2]   ;;  %s16_s11 = int_to_ptr.hbm [resolvable:$true] %s15_s11 }
   0x3   :  { %s17_s13 = sshll.u32 %s182_s12, 4  ;;  %s183_s14 = smov 128   ;;  %s18_s13 = int_to_ptr.vmem [resolvable:$true] %s17_s13 }
   0x4   :  { %s184_s15 = smov 8  }
   0x5   :  { %23 = dma.hbm_to_vmem [thread:$0]  %s16_s11, 512, %s18_s13, [#allocation3], %s183_s14, %s183_s14, %s184_s15  }
   0x6   :  { %176 = dma.done.wait [#allocation3], 512  }
   0x7   :  { %177 = vsyncadd [#allocation3], 4294966784  ;;  %vm32_vm0 = vcmask 523264   ;;  %v28_v0 = vld [vmem:[#allocation2] sm:$0xff]  ;;  %v29_v1 = vld [vmem:[#allocation2 + $0x8] sm:$0xff]  ;;  %s185_s0 = smov [#allocation5]  }
   0x8   :  { %v30_v2 = vld [vmem:[#allocation2 + $0x10] sm:$0xff]  ;;  %v31_v3 = vld [vmem:[#allocation2 + $0x18] sm:$0xff]  ;;  %v33_v4 = vsel %vm32_vm0, %v28_v0, 0.0  ;;  %v34_v5 = vsel %vm32_vm0, %v29_v1, 0.0  ;;  %v48_v7 = vmul.f32 %v28_v0, %v28_v0  ;;  %v49_v9 = vmul.f32 %v29_v1, %v29_v1  ;;  %s71_s16 = sshll.u32 %s185_s0, 4  ;;  %s73_s19 = sshll.u32 %s220_s1, 4  ;;  %s72_s16 = int_to_ptr.vmem [resolvable:$true] %s71_s16  ;;  %s74_s19 = int_to_ptr.hbm [resolvable:$true] %s73_s19 }
   0x9   :  { %v36_v6 = vsel %vm32_vm0, %v30_v2, 0.0  ;;  %v35_v8 = vadd.f32 %v34_v5, %v33_v4  ;;  %v50_v10 = vmul.f32 %v30_v2, %v30_v2  ;;  %v38_v11 = vsel %vm32_vm0, %v31_v3, 0.0  ;;  %s186_s20 = smov [#allocation6]   ;;  %s84_s24 = sshll.u32 %s221_s2, 4  ;;  %s85_s24 = int_to_ptr.hbm [resolvable:$true] %s84_s24 }
   0xa   :  { %v51_v12 = vmul.f32 %v31_v3, %v31_v3  ;;  %v52_v13 = vsel %vm32_vm0, %v48_v7, 0.0  ;;  %v53_v15 = vsel %vm32_vm0, %v49_v9, 0.0  ;;  %vm46_vm1 = vcmask 516096   ;;  %s82_s21 = sshll.u32 %s186_s20, 4  ;;  %s83_s21 = int_to_ptr.vmem [resolvable:$true] %s82_s21 }
   0xb   :  { %v37_v14 = vadd.f32 %v36_v6, %v35_v8  ;;  %v55_v16 = vsel %vm32_vm0, %v50_v10, 0.0  ;;  %v54_v17 = vadd.f32 %v53_v15, %v52_v13 }
   0xc   :  { %v57_v19 = vsel %vm32_vm0, %v51_v12, 0.0 }
   0xd   :  { %v39_v18 = vadd.f32 %v38_v11, %v37_v14  ;;  %v56_v20 = vadd.f32 %v55_v16, %v54_v17 }
   0xf   :  { %v40_v21 = vrot.slane %v39_v18, 4  ;;  %v58_v22 = vadd.f32 %v57_v19, %v56_v20 }
  0x11   :  { %v41_v23 = vadd.f32 %v40_v21, %v39_v18  ;;  %v59_v24 = vrot.slane %v58_v22, 4 }
  0x13   :  { %v42_v25 = vrot.slane %v41_v23, 2  ;;  %v60_v26 = vadd.f32 %v59_v24, %v58_v22 }
  0x15   :  { %v43_v27 = vadd.f32 %v42_v25, %v41_v23  ;;  %v61_v28 = vrot.slane %v60_v26, 2 }
  0x17   :  { %v44_v29 = vrot.slane %v43_v27, 1  ;;  %v62_v30 = vadd.f32 %v61_v28, %v60_v26 }
  0x19   :  { %v45_v31 = vadd.f32 %v44_v29, %v43_v27  ;;  %v63_v32 = vrot.slane %v62_v30, 1 }
  0x1b   :  { %47 = vst.msk [vmem:[#allocation5] sm:$0x1] %vm46_vm1, %v45_v31  ;;  %v64_v33 = vadd.f32 %v63_v32, %v62_v30 }
  0x1c   :  { %76 = dma.vmem_to_hbm [thread:$0]  %s72_s16, 16, %s74_s19, [#allocation4]  }
  0x1d   :  { %65 = vst.msk [vmem:[#allocation6] sm:$0x1] %vm46_vm1, %v64_v33 }
  0x1e   :  { %87 = dma.vmem_to_hbm [thread:$0]  %s83_s21, 16, %s85_s24, [#allocation7]  }
  0x1f   :  { %178 = dma.done.wait [#allocation4], 16  }
  0x20   :  { %179 = vsyncadd [#allocation4], 4294967280 }
  0x21   :  { %180 = dma.done.wait [#allocation7], 16  }
  0x22   :  { %181 = vsyncadd [#allocation7], 4294967280 }
  0x23   :  { %96 = vsyncpa [#allocation3], 1 }
  0x24   :  { %97 = vsyncpa [#allocation4], 1 }
  0x25   :  { %98 = vsyncpa [#allocation7], 1 }

</bundles_post_ra>
